<compile_context>
chip_gen: v7x
topology: tpu7x:2x2x1
jax: 0.10.0
libtpu: 0.0.40
codegen_flags: <defaults>
</compile_context>

<pallas_src>
import functools

import jax
import jax.numpy as jnp
from jax.experimental import pallas as pl
from jax.experimental.pallas import tpu as pltpu


def _round_up(x, m):
    return ((x + m - 1) // m) * m


# ---------------------------------------------------------------------------
# Pallas GEMM kernels: matmul + bias + activation (+ fused SMS mask)
# ---------------------------------------------------------------------------

def _epilogue(acc, b_ref, idx_ref, o_ref, act, masked):
    y = acc + b_ref[...]                          # f32 bias add
    if act == "relu":
        y = jnp.maximum(y, 0.0)
    elif act == "sigmoid":
        y = jax.nn.sigmoid(y)                     # f32 (EUP) path
    if masked:
        # mask[i, j] = 1 if j < idx[i] else 0   (== torch: mask[i, idx:] = 0)
        col = jax.lax.broadcasted_iota(jnp.int32, y.shape, 1)
        y = jnp.where(col < idx_ref[...], y, 0.0)
    o_ref[...] = y.astype(o_ref.dtype)


def _make_gemm_kernel_single_k(act, masked):
    """K fits in one tile: no accumulator scratch, no init/finalize branches."""
    if masked:
        def kernel(x_ref, w_ref, b_ref, idx_ref, o_ref):
            acc = jnp.dot(x_ref[...], w_ref[...], preferred_element_type=jnp.float32)
            _epilogue(acc, b_ref, idx_ref, o_ref, act, True)
    else:
        def kernel(x_ref, w_ref, b_ref, o_ref):
            acc = jnp.dot(x_ref[...], w_ref[...], preferred_element_type=jnp.float32)
            _epilogue(acc, b_ref, None, o_ref, act, False)
    return kernel


def _make_gemm_kernel_multi_k(act, masked):
    """Tiled reduction over K with f32 VMEM accumulator (P3 init/finalize)."""
    if masked:
        def kernel(x_ref, w_ref, b_ref, idx_ref, o_ref, acc_ref):
            k = pl.program_id(1)

            @pl.when(k == 0)
            def _():
                acc_ref[...] = jnp.zeros_like(acc_ref)

            acc_ref[...] += jnp.dot(x_ref[...], w_ref[...],
                                    preferred_element_type=jnp.float32)

            @pl.when(k == pl.num_programs(1) - 1)
            def _():
                _epilogue(acc_ref[...], b_ref, idx_ref, o_ref, act, True)
    else:
        def kernel(x_ref, w_ref, b_ref, o_ref, acc_ref):
            k = pl.program_id(1)

            @pl.when(k == 0)
            def _():
                acc_ref[...] = jnp.zeros_like(acc_ref)

            acc_ref[...] += jnp.dot(x_ref[...], w_ref[...],
                                    preferred_element_type=jnp.float32)

            @pl.when(k == pl.num_programs(1) - 1)
            def _():
                _epilogue(acc_ref[...], b_ref, None, o_ref, act, False)
    return kernel


def matmul_bias_act(x, w, b, act="none", idxs=None, out_dtype=jnp.float32,
                    tm_max=256, tk_whole_max=2048, tk_tile=512):
    """y = act(x @ w + b), optionally SMS-masked by `idxs`, as a tiled Pallas GEMM.

    x: [M, K], w: [K, N] (bf16-friendly), b: [N] f32, idxs: optional [M] int32.
    M is tiled ("parallel", pipelined / megacore-shardable); K is kept whole when
    small (single-pass kernel) or tiled with a VMEM f32 accumulator ("arbitrary")
    when large.  N (small for this model) stays whole per block.
    """
    M, K = x.shape
    K2, N = w.shape
    assert K == K2

    # ---- M tiling ----
    Mp = _round_up(max(M, 8), 8)
    if Mp <= tm_max:
        tm = Mp
    else:
        tm = tm_max
        Mp = _round_up(Mp, tm)

    # ---- K tiling (only for large reduction dims) ----
    if K <= tk_whole_max:
        Kp, tk = K, K
        multi_k = False
    else:
        tk = tk_tile
        Kp = _round_up(K, tk)
        multi_k = True

    xb = x.astype(jnp.bfloat16)
    wb = w.astype(jnp.bfloat16)
    if (Mp, Kp) != (M, K):
        xb = jnp.zeros((Mp, Kp), jnp.bfloat16).at[:M, :K].set(xb)
    if Kp != K:
        wb = jnp.zeros((Kp, N), jnp.bfloat16).at[:K, :].set(wb)
    b2 = b.astype(jnp.float32).reshape(1, N)

    masked = idxs is not None
    args = [xb, wb, b2]
    if masked:
        idxp = jnp.zeros((Mp, 1), jnp.int32).at[:M, 0].set(idxs.astype(jnp.int32))
        args.append(idxp)

    if multi_k:
        in_specs = [
            pl.BlockSpec((tm, tk), lambda i, k: (i, k)),
            pl.BlockSpec((tk, N), lambda i, k: (k, 0)),
            pl.BlockSpec((1, N), lambda i, k: (0, 0)),
        ]
        if masked:
            in_specs.append(pl.BlockSpec((tm, 1), lambda i, k: (i, 0)))
        out = pl.pallas_call(
            _make_gemm_kernel_multi_k(act, masked),
            out_shape=jax.ShapeDtypeStruct((Mp, N), out_dtype),
            grid=(Mp // tm, Kp // tk),
            in_specs=in_specs,
            out_specs=pl.BlockSpec((tm, N), lambda i, k: (i, 0)),
            scratch_shapes=[pltpu.VMEM((tm, N), jnp.float32)],
            compiler_params=pltpu.CompilerParams(
                dimension_semantics=("parallel", "arbitrary")),
        )(*args)
    else:
        in_specs = [
            pl.BlockSpec((tm, tk), lambda i: (i, 0)),
            pl.BlockSpec((tk, N), lambda i: (0, 0)),
            pl.BlockSpec((1, N), lambda i: (0, 0)),
        ]
        if masked:
            in_specs.append(pl.BlockSpec((tm, 1), lambda i: (i, 0)))
        out = pl.pallas_call(
            _make_gemm_kernel_single_k(act, masked),
            out_shape=jax.ShapeDtypeStruct((Mp, N), out_dtype),
            grid=(Mp // tm,),
            in_specs=in_specs,
            out_specs=pl.BlockSpec((tm, N), lambda i: (i, 0)),
            compiler_params=pltpu.CompilerParams(
                dimension_semantics=("parallel",)),
        )(*args)

    return out[:M, :] if Mp != M else out


# ---------------------------------------------------------------------------
# Conv / ConvTranspose expressed as Pallas GEMMs (patch extraction is XLA glue)
# ---------------------------------------------------------------------------

def _im2col(x_nhwc, kh, kw, stride, pad):
    x = jnp.pad(x_nhwc.astype(jnp.bfloat16), ((0, 0), (pad, pad), (pad, pad), (0, 0)))
    B, H, W, C = x.shape
    oh = (H - kh) // stride + 1
    ow = (W - kw) // stride + 1
    patches = []
    for i in range(kh):
        for j in range(kw):
            patches.append(
                x[:, i:i + stride * (oh - 1) + 1:stride,
                     j:j + stride * (ow - 1) + 1:stride, :])
    p = jnp.stack(patches, axis=3)                 # [B, oh, ow, kh*kw, C]
    return p.reshape(B * oh * ow, kh * kw * C), (B, oh, ow)


def conv2d(x_nhwc, w_gemm, b, kh, kw, stride, pad, act, out_dtype=jnp.bfloat16):
    """PyTorch-style Conv2d (cross-correlation) with a GEMM-ready [kh*kw*Cin, Cout] weight."""
    cols, (B, oh, ow) = _im2col(x_nhwc, kh, kw, stride, pad)
    Cout = w_gemm.shape[1]
    y = matmul_bias_act(cols, w_gemm, b, act, out_dtype=out_dtype)
    return y.reshape(B, oh, ow, Cout)


def conv_transpose2d_s2(x_nhwc, w_big, b_big, act, out_dtype=jnp.bfloat16):
    """PyTorch ConvTranspose2d (k=3, s=2, p=1, op=1) via sub-pixel decomposition.

    One GEMM of the [B*H*W, 4*Cin] 2x2-patch matrix against a [4*Cin, 4*Cout]
    weight produces all four output sub-grids, which are interleaved to [2H, 2W].
    `b_big` is the 4x-tiled bias (precomputed in init_params).
    """
    B, H, W, C = x_nhwc.shape
    Cout = w_big.shape[1] // 4
    xp = jnp.pad(x_nhwc.astype(jnp.bfloat16), ((0, 0), (0, 1), (0, 1), (0, 0)))
    patches = [xp[:, da:da + H, db:db + W, :] for da in (0, 1) for db in (0, 1)]
    p = jnp.stack(patches, axis=3)                 # [B, H, W, 4, Cin]
    cols = p.reshape(B * H * W, 4 * C)
    y = matmul_bias_act(cols, w_big, b_big, act, out_dtype=out_dtype)  # [B*H*W, 4*Cout]
    y = y.reshape(B, H, W, 2, 2, Cout)
    y = jnp.transpose(y, (0, 1, 3, 2, 4, 5))       # [B, H, 2, W, 2, Cout]
    return y.reshape(B, 2 * H, 2 * W, Cout)


# ---------------------------------------------------------------------------
# Weight preparation (hoisted out of forward) + parameter init
# ---------------------------------------------------------------------------

def _conv_weight_to_gemm(w_oihw):
    """[Cout, Cin, KH, KW] -> im2col-ordered [KH*KW*Cin, Cout]."""
    Cout, Cin, KH, KW = w_oihw.shape
    return jnp.transpose(w_oihw, (2, 3, 1, 0)).reshape(KH * KW * Cin, Cout)


def _convt_weight_to_subpixel_gemm(w_iohw):
    """ConvTranspose2d weight [Cin, Cout, 3, 3] -> sub-pixel GEMM weight [4*Cin, 4*Cout].

    Row index  = (da*2 + db)*Cin + ci   for input tap x[p+da, q+db]
    Col index  = (r*2 + s)*Cout + co    for output pixel out[2p+r, 2q+s]
    Entry      = W_t[ci, co, 1+r-2*da, 1+s-2*db]  (zero if index out of [0,2]).
    Reproduces PyTorch ConvTranspose2d(k=3, s=2, p=1, output_padding=1).
    """
    Cin, Cout, KH, KW = w_iohw.shape
    assert KH == 3 and KW == 3
    Wb = jnp.zeros((2, 2, Cin, 2, 2, Cout), jnp.float32)
    for da in (0, 1):
        for db in (0, 1):
            for r in (0, 1):
                for s in (0, 1):
                    kh = 1 + r - 2 * da
                    kw = 1 + s - 2 * db
                    if 0 <= kh < 3 and 0 <= kw < 3:
                        Wb = Wb.at[da, db, :, r, s, :].set(w_iohw[:, :, kh, kw])
    return Wb.reshape(4 * Cin, 4 * Cout)


def init_params(key, width, height, in_ch, channel_factor, latent_dim):
    cf = channel_factor
    fh, fw = height // 4, width // 4
    flat = 2 * cf * fh * fw
    ks = jax.random.split(key, 6)

    def w(k, shape, fan_in):
        return jax.random.normal(k, shape, jnp.float32) / jnp.sqrt(fan_in)

    enc_w1 = w(ks[0], (cf, in_ch, 3, 3), in_ch * 9)        # Conv2d  [Cout, Cin, KH, KW]
    enc_w2 = w(ks[1], (2 * cf, cf, 3, 3), cf * 9)
    enc_wl = w(ks[2], (flat, latent_dim), flat)             # Linear stored [in, out]
    dec_wl = w(ks[3], (latent_dim, flat), latent_dim)
    dec_wt1 = w(ks[4], (2 * cf, cf, 3, 3), 2 * cf * 9)      # ConvT   [Cin, Cout, KH, KW]
    dec_wt2 = w(ks[5], (cf, in_ch, 3, 3), cf * 9)

    bf16 = jnp.bfloat16
    return {
        # GEMM-ready, bf16 (MXU-native); biases stay f32.
        "enc_w1": _conv_weight_to_gemm(enc_w1).astype(bf16),
        "enc_b1": jnp.zeros((cf,), jnp.float32),
        "enc_w2": _conv_weight_to_gemm(enc_w2).astype(bf16),
        "enc_b2": jnp.zeros((2 * cf,), jnp.float32),
        "enc_wl": enc_wl.astype(bf16),
        "enc_bl": jnp.zeros((latent_dim,), jnp.float32),
        "dec_wl": dec_wl.astype(bf16),
        "dec_bl": jnp.zeros((flat,), jnp.float32),
        "dec_wt1": _convt_weight_to_subpixel_gemm(dec_wt1).astype(bf16),
        "dec_bt1": jnp.zeros((4 * cf,), jnp.float32),        # 4x-tiled sub-pixel bias
        "dec_wt2": _convt_weight_to_subpixel_gemm(dec_wt2).astype(bf16),
        "dec_bt2": jnp.zeros((4 * in_ch,), jnp.float32),     # 4x-tiled sub-pixel bias
    }


# ---------------------------------------------------------------------------
# SMSCAE forward
# ---------------------------------------------------------------------------

def smscae_forward(params, x_nchw, key, width, height, channel_factor,
                   latent_dim, mode="train"):
    """Returns (reconstruction [B, C, H, W], masked latent [B, latent_dim])."""
    cf = channel_factor
    B = x_nchw.shape[0]
    x = jnp.transpose(x_nchw, (0, 2, 3, 1))  # NCHW -> NHWC

    # ----- encoder -----
    h = conv2d(x, params["enc_w1"], params["enc_b1"], 3, 3, stride=2, pad=1,
               act="relu", out_dtype=jnp.bfloat16)
    h = conv2d(h, params["enc_w2"], params["enc_b2"], 3, 3, stride=2, pad=1,
               act="relu", out_dtype=jnp.bfloat16)
    flat = h.reshape(B, -1)

    # ----- SMS masking indices (data-dependent truncation of the latent) -----
    dims = latent_dim
    if mode != "train":
        idxs = jnp.full((B,), dims, dtype=jnp.int32)
    else:
        idxs = jax.random.randint(key, (B,), 1, dims + 1, dtype=jnp.int32)

    # encoder linear + SMS mask fused in one Pallas kernel; latent returned in f32
    lat = matmul_bias_act(flat, params["enc_wl"], params["enc_bl"],
                          act="none", idxs=idxs, out_dtype=jnp.float32)

    # ----- decoder -----
    d = matmul_bias_act(lat, params["dec_wl"], params["dec_bl"], act="relu",
                        out_dtype=jnp.bfloat16)
    d = d.reshape(B, height // 4, width // 4, 2 * cf)
    d = conv_transpose2d_s2(d, params["dec_wt1"], params["dec_bt1"], act="relu",
                            out_dtype=jnp.bfloat16)
    recon = conv_transpose2d_s2(d, params["dec_wt2"], params["dec_bt2"],
                                act="sigmoid", out_dtype=jnp.float32)
    recon_nchw = jnp.transpose(recon, (0, 3, 1, 2))  # NHWC -> NCHW
    return recon_nchw, lat


if __name__ == "__main__":
    # Small shapes consistent with the module: batch=2, 1-channel 16x16 images,
    # channel_factor=4, latent_dim=32.
    B, C, H, W = 2, 1, 16, 16
    channel_factor, latent_dim = 4, 32

    root = jax.random.PRNGKey(0)
    k_param, k_data, k_mask = jax.random.split(root, 3)

    params = init_params(k_param, W, H, C, channel_factor, latent_dim)
    x = jax.random.normal(k_data, (B, C, H, W), jnp.float32)

    fwd_train = jax.jit(functools.partial(
        smscae_forward, width=W, height=H, channel_factor=channel_factor,
        latent_dim=latent_dim, mode="train"))
    fwd_eval = jax.jit(functools.partial(
        smscae_forward, width=W, height=H, channel_factor=channel_factor,
        latent_dim=latent_dim, mode="eval"))

    recon, lat = fwd_train(params, x, k_mask)
    recon = jax.block_until_ready(recon)
    lat = jax.block_until_ready(lat)

    assert recon.shape == (B, C, H, W), recon.shape
    assert lat.shape == (B, latent_dim), lat.shape
    assert bool(jnp.all(jnp.isfinite(recon))) and bool(jnp.all(jnp.isfinite(lat)))
    # sigmoid output range sanity
    assert bool(jnp.all(recon >= 0.0)) and bool(jnp.all(recon <= 1.0))
    # SMS mask sanity: every row of the latent is zero past its (random) cutoff
    idx_chk = jax.random.randint(k_mask, (B,), 1, latent_dim + 1, dtype=jnp.int32)
    cols = jnp.arange(latent_dim)[None, :]
    assert bool(jnp.all(jnp.where(cols >= idx_chk[:, None], lat, 0.0) == 0.0))

    # eval mode (no truncation) also exercises the fused-mask kernel path
    recon_e, lat_e = fwd_eval(params, x, k_mask)
    jax.block_until_ready(recon_e)
    assert recon_e.shape == (B, C, H, W)

    print("KERNEL_OK")
</pallas_src>

<mosaic_0001>
module attributes {stable_mosaic.version = 11 : i64} {
  func.func @kernel(%arg0: i32, %arg1: memref<128x9xbf16, #tpu.memory_space<vmem>>, %arg2: memref<9x4xbf16, #tpu.memory_space<vmem>>, %arg3: memref<1x4xf32, #tpu.memory_space<vmem>>, %arg4: memref<128x4xbf16, #tpu.memory_space<vmem>>) attributes {dimension_semantics = [#tpu.dimension_semantics<parallel>], iteration_bounds = array<i64: 1>, scalar_prefetch = 0 : i64, scratch_operands = 0 : i64, tpu.core_type = #tpu.core_type<tc>, window_params = [{transform_indices = @transform_0, window_bounds = array<i64: 128, 9>}, {pipeline_mode = #tpu.pipeline_mode<synchronous>, transform_indices = @transform_1, window_bounds = array<i64: 9, 4>}, {pipeline_mode = #tpu.pipeline_mode<synchronous>, transform_indices = @transform_2, window_bounds = array<i64: 1, 4>}, {transform_indices = @transform_3, window_bounds = array<i64: 128, 4>}]} {
    %c0 = arith.constant 0 : index
    %c0_0 = arith.constant 0 : index
    %0 = vector.load %arg1[%c0, %c0_0] : memref<128x9xbf16, #tpu.memory_space<vmem>>, vector<128x9xbf16>
    %c0_1 = arith.constant 0 : index
    %c0_2 = arith.constant 0 : index
    %1 = vector.load %arg2[%c0_1, %c0_2] : memref<9x4xbf16, #tpu.memory_space<vmem>>, vector<9x4xbf16>
    %cst = arith.constant dense<0.000000e+00> : vector<128x4xf32>
    %2 = tpu.matmul %0, %1, %cst {dimension_numbers = #tpu.dot_dimension_numbers<[1], [0], [0], [1], [0, 0, 1, 1], [], []>} : vector<128x9xbf16>, vector<9x4xbf16>, vector<128x4xf32> -> vector<128x4xf32>
    %c0_3 = arith.constant 0 : index
    %c0_4 = arith.constant 0 : index
    %3 = vector.load %arg3[%c0_3, %c0_4] : memref<1x4xf32, #tpu.memory_space<vmem>>, vector<1x4xf32>
    %4 = vector.broadcast %3 : vector<1x4xf32> to vector<128x4xf32>
    %5 = arith.addf %2, %4 : vector<128x4xf32>
    %cst_5 = arith.constant 0.000000e+00 : f32
    %6 = vector.broadcast %cst_5 : f32 to vector<128x4xf32>
    %7 = arith.maximumf %5, %6 : vector<128x4xf32>
    %8 = arith.truncf %7 : vector<128x4xf32> to vector<128x4xbf16>
    %c0_6 = arith.constant 0 : index
    %c0_7 = arith.constant 0 : index
    %9 = vector.load %arg4[%c0_6, %c0_7] : memref<128x4xbf16, #tpu.memory_space<vmem>>, vector<128x4xbf16>
    tpu.vector_store %arg4[%c0_6, %c0_7], %8 {strides = array<i32>} : memref<128x4xbf16, #tpu.memory_space<vmem>>, vector<128x4xbf16>,
    return
  }
  func.func @transform_0(%arg0: i32) -> (i32, i32) {
    %c0_i32 = arith.constant 0 : i32
    %c0_i32_0 = arith.constant 0 : i32
    return %arg0, %c0_i32 : i32, i32
  }
  func.func @transform_1(%arg0: i32) -> (i32, i32) {
    %c0_i32 = arith.constant 0 : i32
    %c0_i32_0 = arith.constant 0 : i32
    %c0_i32_1 = arith.constant 0 : i32
    return %c0_i32, %c0_i32_0 : i32, i32
  }
  func.func @transform_2(%arg0: i32) -> (i32, i32) {
    %c0_i32 = arith.constant 0 : i32
    %c0_i32_0 = arith.constant 0 : i32
    %c0_i32_1 = arith.constant 0 : i32
    return %c0_i32, %c0_i32_0 : i32, i32
  }
  func.func @transform_3(%arg0: i32) -> (i32, i32) {
    %c0_i32 = arith.constant 0 : i32
    %c0_i32_0 = arith.constant 0 : i32
    return %arg0, %c0_i32 : i32, i32
  }
}

module attributes {stable_mosaic.version = 11 : i64} {
  func.func @kernel(%arg0: i32, %arg1: memref<32x36xbf16, #tpu.memory_space<vmem>>, %arg2: memref<36x8xbf16, #tpu.memory_space<vmem>>, %arg3: memref<1x8xf32, #tpu.memory_space<vmem>>, %arg4: memref<32x8xbf16, #tpu.memory_space<vmem>>) attributes {dimension_semantics = [#tpu.dimension_semantics<parallel>], iteration_bounds = array<i64: 1>, scalar_prefetch = 0 : i64, scratch_operands = 0 : i64, tpu.core_type = #tpu.core_type<tc>, window_params = [{transform_indices = @transform_0, window_bounds = array<i64: 32, 36>}, {pipeline_mode = #tpu.pipeline_mode<synchronous>, transform_indices = @transform_1, window_bounds = array<i64: 36, 8>}, {pipeline_mode = #tpu.pipeline_mode<synchronous>, transform_indices = @transform_2, window_bounds = array<i64: 1, 8>}, {transform_indices = @transform_3, window_bounds = array<i64: 32, 8>}]} {
    %c0 = arith.constant 0 : index
    %c0_0 = arith.constant 0 : index
    %0 = vector.load %arg1[%c0, %c0_0] : memref<32x36xbf16, #tpu.memory_space<vmem>>, vector<32x36xbf16>
    %c0_1 = arith.constant 0 : index
    %c0_2 = arith.constant 0 : index
    %1 = vector.load %arg2[%c0_1, %c0_2] : memref<36x8xbf16, #tpu.memory_space<vmem>>, vector<36x8xbf16>
    %cst = arith.constant dense<0.000000e+00> : vector<32x8xf32>
    %2 = tpu.matmul %0, %1, %cst {dimension_numbers = #tpu.dot_dimension_numbers<[1], [0], [0], [1], [0, 0, 1, 1], [], []>} : vector<32x36xbf16>, vector<36x8xbf16>, vector<32x8xf32> -> vector<32x8xf32>
    %c0_3 = arith.constant 0 : index
    %c0_4 = arith.constant 0 : index
    %3 = vector.load %arg3[%c0_3, %c0_4] : memref<1x8xf32, #tpu.memory_space<vmem>>, vector<1x8xf32>
    %4 = vector.broadcast %3 : vector<1x8xf32> to vector<32x8xf32>
    %5 = arith.addf %2, %4 : vector<32x8xf32>
    %cst_5 = arith.constant 0.000000e+00 : f32
    %6 = vector.broadcast %cst_5 : f32 to vector<32x8xf32>
    %7 = arith.maximumf %5, %6 : vector<32x8xf32>
    %8 = arith.truncf %7 : vector<32x8xf32> to vector<32x8xbf16>
    %c0_6 = arith.constant 0 : index
    %c0_7 = arith.constant 0 : index
    %9 = vector.load %arg4[%c0_6, %c0_7] : memref<32x8xbf16, #tpu.memory_space<vmem>>, vector<32x8xbf16>
    tpu.vector_store %arg4[%c0_6, %c0_7], %8 {strides = array<i32>} : memref<32x8xbf16, #tpu.memory_space<vmem>>, vector<32x8xbf16>,
    return
  }
  func.func @transform_0(%arg0: i32) -> (i32, i32) {
    %c0_i32 = arith.constant 0 : i32
    %c0_i32_0 = arith.constant 0 : i32
    return %arg0, %c0_i32 : i32, i32
  }
  func.func @transform_1(%arg0: i32) -> (i32, i32) {
    %c0_i32 = arith.constant 0 : i32
    %c0_i32_0 = arith.constant 0 : i32
    %c0_i32_1 = arith.constant 0 : i32
    return %c0_i32, %c0_i32_0 : i32, i32
  }
  func.func @transform_2(%arg0: i32) -> (i32, i32) {
    %c0_i32 = arith.constant 0 : i32
    %c0_i32_0 = arith.constant 0 : i32
    %c0_i32_1 = arith.constant 0 : i32
    return %c0_i32, %c0_i32_0 : i32, i32
  }
  func.func @transform_3(%arg0: i32) -> (i32, i32) {
    %c0_i32 = arith.constant 0 : i32
    %c0_i32_0 = arith.constant 0 : i32
    return %arg0, %c0_i32 : i32, i32
  }
}

module attributes {stable_mosaic.version = 11 : i64} {
  func.func @kernel(%arg0: i32, %arg1: memref<8x128xbf16, #tpu.memory_space<vmem>>, %arg2: memref<128x32xbf16, #tpu.memory_space<vmem>>, %arg3: memref<1x32xf32, #tpu.memory_space<vmem>>, %arg4: memref<8x1xi32, #tpu.memory_space<vmem>>, %arg5: memref<8x32xf32, #tpu.memory_space<vmem>>) attributes {dimension_semantics = [#tpu.dimension_semantics<parallel>], iteration_bounds = array<i64: 1>, scalar_prefetch = 0 : i64, scratch_operands = 0 : i64, tpu.core_type = #tpu.core_type<tc>, window_params = [{transform_indices = @transform_0, window_bounds = array<i64: 8, 128>}, {pipeline_mode = #tpu.pipeline_mode<synchronous>, transform_indices = @transform_1, window_bounds = array<i64: 128, 32>}, {pipeline_mode = #tpu.pipeline_mode<synchronous>, transform_indices = @transform_2, window_bounds = array<i64: 1, 32>}, {transform_indices = @transform_3, window_bounds = array<i64: 8, 1>}, {transform_indices = @transform_4, window_bounds = array<i64: 8, 32>}]} {
    %c0 = arith.constant 0 : index
    %c0_0 = arith.constant 0 : index
    %0 = vector.load %arg1[%c0, %c0_0] : memref<8x128xbf16, #tpu.memory_space<vmem>>, vector<8x128xbf16>
    %c0_1 = arith.constant 0 : index
    %c0_2 = arith.constant 0 : index
    %1 = vector.load %arg2[%c0_1, %c0_2] : memref<128x32xbf16, #tpu.memory_space<vmem>>, vector<128x32xbf16>
    %cst = arith.constant dense<0.000000e+00> : vector<8x32xf32>
    %2 = tpu.matmul %0, %1, %cst {dimension_numbers = #tpu.dot_dimension_numbers<[1], [0], [0], [1], [0, 0, 1, 1], [], []>} : vector<8x128xbf16>, vector<128x32xbf16>, vector<8x32xf32> -> vector<8x32xf32>
    %c0_3 = arith.constant 0 : index
    %c0_4 = arith.constant 0 : index
    %3 = vector.load %arg3[%c0_3, %c0_4] : memref<1x32xf32, #tpu.memory_space<vmem>>, vector<1x32xf32>
    %4 = vector.broadcast %3 : vector<1x32xf32> to vector<8x32xf32>
    %5 = arith.addf %2, %4 : vector<8x32xf32>
    %6 = tpu.iota {dimensions = array<i32: 1>} : vector<8x32xi32>
    %c0_5 = arith.constant 0 : index
    %c0_6 = arith.constant 0 : index
    %7 = vector.load %arg4[%c0_5, %c0_6] : memref<8x1xi32, #tpu.memory_space<vmem>>, vector<8x1xi32>
    %8 = vector.broadcast %7 : vector<8x1xi32> to vector<8x32xi32>
    %9 = arith.cmpi slt, %6, %8 : vector<8x32xi32>
    %cst_7 = arith.constant 0.000000e+00 : f32
    %10 = vector.broadcast %cst_7 : f32 to vector<8x32xf32>
    %11 = arith.select %9, %5, %10 : vector<8x32xi1>, vector<8x32xf32>
    %c0_8 = arith.constant 0 : index
    %c0_9 = arith.constant 0 : index
    %12 = vector.load %arg5[%c0_8, %c0_9] : memref<8x32xf32, #tpu.memory_space<vmem>>, vector<8x32xf32>
    tpu.vector_store %arg5[%c0_8, %c0_9], %11 {strides = array<i32>} : memref<8x32xf32, #tpu.memory_space<vmem>>, vector<8x32xf32>,
    return
  }
  func.func @transform_0(%arg0: i32) -> (i32, i32) {
    %c0_i32 = arith.constant 0 : i32
    %c0_i32_0 = arith.constant 0 : i32
    return %arg0, %c0_i32 : i32, i32
  }
  func.func @transform_1(%arg0: i32) -> (i32, i32) {
    %c0_i32 = arith.constant 0 : i32
    %c0_i32_0 = arith.constant 0 : i32
    %c0_i32_1 = arith.constant 0 : i32
    return %c0_i32, %c0_i32_0 : i32, i32
  }
  func.func @transform_2(%arg0: i32) -> (i32, i32) {
    %c0_i32 = arith.constant 0 : i32
    %c0_i32_0 = arith.constant 0 : i32
    %c0_i32_1 = arith.constant 0 : i32
    return %c0_i32, %c0_i32_0 : i32, i32
  }
  func.func @transform_3(%arg0: i32) -> (i32, i32) {
    %c0_i32 = arith.constant 0 : i32
    %c0_i32_0 = arith.constant 0 : i32
    return %arg0, %c0_i32 : i32, i32
  }
  func.func @transform_4(%arg0: i32) -> (i32, i32) {
    %c0_i32 = arith.constant 0 : i32
    %c0_i32_0 = arith.constant 0 : i32
    return %arg0, %c0_i32 : i32, i32
  }
}

module attributes {stable_mosaic.version = 11 : i64} {
  func.func @kernel(%arg0: i32, %arg1: memref<8x32xbf16, #tpu.memory_space<vmem>>, %arg2: memref<32x128xbf16, #tpu.memory_space<vmem>>, %arg3: memref<1x128xf32, #tpu.memory_space<vmem>>, %arg4: memref<8x128xbf16, #tpu.memory_space<vmem>>) attributes {dimension_semantics = [#tpu.dimension_semantics<parallel>], iteration_bounds = array<i64: 1>, scalar_prefetch = 0 : i64, scratch_operands = 0 : i64, tpu.core_type = #tpu.core_type<tc>, window_params = [{transform_indices = @transform_0, window_bounds = array<i64: 8, 32>}, {pipeline_mode = #tpu.pipeline_mode<synchronous>, transform_indices = @transform_1, window_bounds = array<i64: 32, 128>}, {pipeline_mode = #tpu.pipeline_mode<synchronous>, transform_indices = @transform_2, window_bounds = array<i64: 1, 128>}, {transform_indices = @transform_3, window_bounds = array<i64: 8, 128>}]} {
    %c0 = arith.constant 0 : index
    %c0_0 = arith.constant 0 : index
    %0 = vector.load %arg1[%c0, %c0_0] : memref<8x32xbf16, #tpu.memory_space<vmem>>, vector<8x32xbf16>
    %c0_1 = arith.constant 0 : index
    %c0_2 = arith.constant 0 : index
    %1 = vector.load %arg2[%c0_1, %c0_2] : memref<32x128xbf16, #tpu.memory_space<vmem>>, vector<32x128xbf16>
    %cst = arith.constant dense<0.000000e+00> : vector<8x128xf32>
    %2 = tpu.matmul %0, %1, %cst {dimension_numbers = #tpu.dot_dimension_numbers<[1], [0], [0], [1], [0, 0, 1, 1], [], []>} : vector<8x32xbf16>, vector<32x128xbf16>, vector<8x128xf32> -> vector<8x128xf32>
    %c0_3 = arith.constant 0 : index
    %c0_4 = arith.constant 0 : index
    %3 = vector.load %arg3[%c0_3, %c0_4] : memref<1x128xf32, #tpu.memory_space<vmem>>, vector<1x128xf32>
    %4 = vector.broadcast %3 : vector<1x128xf32> to vector<8x128xf32>
    %5 = arith.addf %2, %4 : vector<8x128xf32>
    %cst_5 = arith.constant 0.000000e+00 : f32
    %6 = vector.broadcast %cst_5 : f32 to vector<8x128xf32>
    %7 = arith.maximumf %5, %6 : vector<8x128xf32>
    %8 = arith.truncf %7 : vector<8x128xf32> to vector<8x128xbf16>
    %c0_6 = arith.constant 0 : index
    %c0_7 = arith.constant 0 : index
    %9 = vector.load %arg4[%c0_6, %c0_7] : memref<8x128xbf16, #tpu.memory_space<vmem>>, vector<8x128xbf16>
    tpu.vector_store %arg4[%c0_6, %c0_7], %8 {strides = array<i32>} : memref<8x128xbf16, #tpu.memory_space<vmem>>, vector<8x128xbf16>,
    return
  }
  func.func @transform_0(%arg0: i32) -> (i32, i32) {
    %c0_i32 = arith.constant 0 : i32
    %c0_i32_0 = arith.constant 0 : i32
    return %arg0, %c0_i32 : i32, i32
  }
  func.func @transform_1(%arg0: i32) -> (i32, i32) {
    %c0_i32 = arith.constant 0 : i32
    %c0_i32_0 = arith.constant 0 : i32
    %c0_i32_1 = arith.constant 0 : i32
    return %c0_i32, %c0_i32_0 : i32, i32
  }
  func.func @transform_2(%arg0: i32) -> (i32, i32) {
    %c0_i32 = arith.constant 0 : i32
    %c0_i32_0 = arith.constant 0 : i32
    %c0_i32_1 = arith.constant 0 : i32
    return %c0_i32, %c0_i32_0 : i32, i32
  }
  func.func @transform_3(%arg0: i32) -> (i32, i32) {
    %c0_i32 = arith.constant 0 : i32
    %c0_i32_0 = arith.constant 0 : i32
    return %arg0, %c0_i32 : i32, i32
  }
}

module attributes {stable_mosaic.version = 11 : i64} {
  func.func @kernel(%arg0: i32, %arg1: memref<32x32xbf16, #tpu.memory_space<vmem>>, %arg2: memref<32x16xbf16, #tpu.memory_space<vmem>>, %arg3: memref<1x16xf32, #tpu.memory_space<vmem>>, %arg4: memref<32x16xbf16, #tpu.memory_space<vmem>>) attributes {dimension_semantics = [#tpu.dimension_semantics<parallel>], iteration_bounds = array<i64: 1>, scalar_prefetch = 0 : i64, scratch_operands = 0 : i64, tpu.core_type = #tpu.core_type<tc>, window_params = [{transform_indices = @transform_0, window_bounds = array<i64: 32, 32>}, {pipeline_mode = #tpu.pipeline_mode<synchronous>, transform_indices = @transform_1, window_bounds = array<i64: 32, 16>}, {pipeline_mode = #tpu.pipeline_mode<synchronous>, transform_indices = @transform_2, window_bounds = array<i64: 1, 16>}, {transform_indices = @transform_3, window_bounds = array<i64: 32, 16>}]} {
    %c0 = arith.constant 0 : index
    %c0_0 = arith.constant 0 : index
    %0 = vector.load %arg1[%c0, %c0_0] : memref<32x32xbf16, #tpu.memory_space<vmem>>, vector<32x32xbf16>
    %c0_1 = arith.constant 0 : index
    %c0_2 = arith.constant 0 : index
    %1 = vector.load %arg2[%c0_1, %c0_2] : memref<32x16xbf16, #tpu.memory_space<vmem>>, vector<32x16xbf16>
    %cst = arith.constant dense<0.000000e+00> : vector<32x16xf32>
    %2 = tpu.matmul %0, %1, %cst {dimension_numbers = #tpu.dot_dimension_numbers<[1], [0], [0], [1], [0, 0, 1, 1], [], []>} : vector<32x32xbf16>, vector<32x16xbf16>, vector<32x16xf32> -> vector<32x16xf32>
    %c0_3 = arith.constant 0 : index
    %c0_4 = arith.constant 0 : index
    %3 = vector.load %arg3[%c0_3, %c0_4] : memref<1x16xf32, #tpu.memory_space<vmem>>, vector<1x16xf32>
    %4 = vector.broadcast %3 : vector<1x16xf32> to vector<32x16xf32>
    %5 = arith.addf %2, %4 : vector<32x16xf32>
    %cst_5 = arith.constant 0.000000e+00 : f32
    %6 = vector.broadcast %cst_5 : f32 to vector<32x16xf32>
    %7 = arith.maximumf %5, %6 : vector<32x16xf32>
    %8 = arith.truncf %7 : vector<32x16xf32> to vector<32x16xbf16>
    %c0_6 = arith.constant 0 : index
    %c0_7 = arith.constant 0 : index
    %9 = vector.load %arg4[%c0_6, %c0_7] : memref<32x16xbf16, #tpu.memory_space<vmem>>, vector<32x16xbf16>
    tpu.vector_store %arg4[%c0_6, %c0_7], %8 {strides = array<i32>} : memref<32x16xbf16, #tpu.memory_space<vmem>>, vector<32x16xbf16>,
    return
  }
  func.func @transform_0(%arg0: i32) -> (i32, i32) {
    %c0_i32 = arith.constant 0 : i32
    %c0_i32_0 = arith.constant 0 : i32
    return %arg0, %c0_i32 : i32, i32
  }
  func.func @transform_1(%arg0: i32) -> (i32, i32) {
    %c0_i32 = arith.constant 0 : i32
    %c0_i32_0 = arith.constant 0 : i32
    %c0_i32_1 = arith.constant 0 : i32
    return %c0_i32, %c0_i32_0 : i32, i32
  }
  func.func @transform_2(%arg0: i32) -> (i32, i32) {
    %c0_i32 = arith.constant 0 : i32
    %c0_i32_0 = arith.constant 0 : i32
    %c0_i32_1 = arith.constant 0 : i32
    return %c0_i32, %c0_i32_0 : i32, i32
  }
  func.func @transform_3(%arg0: i32) -> (i32, i32) {
    %c0_i32 = arith.constant 0 : i32
    %c0_i32_0 = arith.constant 0 : i32
    return %arg0, %c0_i32 : i32, i32
  }
}

module attributes {stable_mosaic.version = 11 : i64} {
  func.func @kernel(%arg0: i32, %arg1: memref<128x16xbf16, #tpu.memory_space<vmem>>, %arg2: memref<16x4xbf16, #tpu.memory_space<vmem>>, %arg3: memref<1x4xf32, #tpu.memory_space<vmem>>, %arg4: memref<128x4xf32, #tpu.memory_space<vmem>>) attributes {dimension_semantics = [#tpu.dimension_semantics<parallel>], iteration_bounds = array<i64: 1>, scalar_prefetch = 0 : i64, scratch_operands = 0 : i64, tpu.core_type = #tpu.core_type<tc>, window_params = [{transform_indices = @transform_0, window_bounds = array<i64: 128, 16>}, {pipeline_mode = #tpu.pipeline_mode<synchronous>, transform_indices = @transform_1, window_bounds = array<i64: 16, 4>}, {pipeline_mode = #tpu.pipeline_mode<synchronous>, transform_indices = @transform_2, window_bounds = array<i64: 1, 4>}, {transform_indices = @transform_3, window_bounds = array<i64: 128, 4>}]} {
    %c0 = arith.constant 0 : index
    %c0_0 = arith.constant 0 : index
    %0 = vector.load %arg1[%c0, %c0_0] : memref<128x16xbf16, #tpu.memory_space<vmem>>, vector<128x16xbf16>
    %c0_1 = arith.constant 0 : index
    %c0_2 = arith.constant 0 : index
    %1 = vector.load %arg2[%c0_1, %c0_2] : memref<16x4xbf16, #tpu.memory_space<vmem>>, vector<16x4xbf16>
    %cst = arith.constant dense<0.000000e+00> : vector<128x4xf32>
    %2 = tpu.matmul %0, %1, %cst {dimension_numbers = #tpu.dot_dimension_numbers<[1], [0], [0], [1], [0, 0, 1, 1], [], []>} : vector<128x16xbf16>, vector<16x4xbf16>, vector<128x4xf32> -> vector<128x4xf32>
    %c0_3 = arith.constant 0 : index
    %c0_4 = arith.constant 0 : index
    %3 = vector.load %arg3[%c0_3, %c0_4] : memref<1x4xf32, #tpu.memory_space<vmem>>, vector<1x4xf32>
    %4 = vector.broadcast %3 : vector<1x4xf32> to vector<128x4xf32>
    %5 = arith.addf %2, %4 : vector<128x4xf32>
    %6 = arith.negf %5 : vector<128x4xf32>
    %7 = math.exp %6 : vector<128x4xf32>
    %cst_5 = arith.constant 1.000000e+00 : f32
    %8 = vector.broadcast %cst_5 : f32 to vector<128x4xf32>
    %9 = arith.addf %8, %7 : vector<128x4xf32>
    %10 = arith.divf %8, %9 : vector<128x4xf32>
    %c0_6 = arith.constant 0 : index
    %c0_7 = arith.constant 0 : index
    %11 = vector.load %arg4[%c0_6, %c0_7] : memref<128x4xf32, #tpu.memory_space<vmem>>, vector<128x4xf32>
    tpu.vector_store %arg4[%c0_6, %c0_7], %10 {strides = array<i32>} : memref<128x4xf32, #tpu.memory_space<vmem>>, vector<128x4xf32>,
    return
  }
  func.func @transform_0(%arg0: i32) -> (i32, i32) {
    %c0_i32 = arith.constant 0 : i32
    %c0_i32_0 = arith.constant 0 : i32
    return %arg0, %c0_i32 : i32, i32
  }
  func.func @transform_1(%arg0: i32) -> (i32, i32) {
    %c0_i32 = arith.constant 0 : i32
    %c0_i32_0 = arith.constant 0 : i32
    %c0_i32_1 = arith.constant 0 : i32
    return %c0_i32, %c0_i32_0 : i32, i32
  }
  func.func @transform_2(%arg0: i32) -> (i32, i32) {
    %c0_i32 = arith.constant 0 : i32
    %c0_i32_0 = arith.constant 0 : i32
    %c0_i32_1 = arith.constant 0 : i32
    return %c0_i32, %c0_i32_0 : i32, i32
  }
  func.func @transform_3(%arg0: i32) -> (i32, i32) {
    %c0_i32 = arith.constant 0 : i32
    %c0_i32_0 = arith.constant 0 : i32
    return %arg0, %c0_i32 : i32, i32
  }
}

</mosaic_0001>

<bundles_post_ra>
// kernel: smscae_forward.6
= control target key start
LH: loop header
LB: loop body
LE: loop exit
PB: predicated region body
PF: predicated region fallthrough
CT: control target
= control target key end

     0   :  { %vm110_vm0 = vcmask 1043456   ;;  %vm111_vm1 = vcmask 1044480   ;;  %vm85_vm2 = vcmask 72704   ;;  %v404_v1 = vmov 65535   ;;  %s527_s1 = inlined_call_operand.vmem [shape: bf16[9,4], index: 1, kind: input, shape index: {}]   ;;  %s528_s0 = inlined_call_operand.vmem [shape: bf16[128,9], index: 0, kind: input, shape index: {}]   ;;  %s529_s2 = inlined_call_operand.vmem [shape: f32[1,4], index: 2, kind: input, shape index: {}]   ;;  %s530_s3 = inlined_call_operand.vmem [shape: bf16[128,4], index: 3, kind: output, shape index: {}]  }
   0x1   :  { %v395_v0 = vld [vmem:[%s527_s1] sm:$0x1f]   ;;  %v112_v2 = vsel %vm110_vm0, 4294967295, %v404_v1  ;;  %v398_v7 = vld [vmem:[%s528_s0 + $0x8] sm:$0xff]   ;;  %v400_v9 = vld [vmem:[%s528_s0 + $0x10] sm:$0xff]   ;;  %vm294_vm3 = vcmask 27648  }
   0x2   :  { %v396_v3 = vld [vmem:[%s528_s0] sm:$0xff]   ;;  %v113_v4 = vsel %vm111_vm1, %v112_v2, 0  ;;  %v399_v8 = vld [vmem:[%s528_s0 + $0x28] sm:$0xff]   ;;  %v401_v10 = vld [vmem:[%s528_s0 + $0x30] sm:$0xff]  }
   0x3   :  { %v397_v5 = vld [vmem:[%s528_s0 + $0x20] sm:$0xff]   ;;  %v115_v6 = vand.u32 %v395_v0, %v113_v4  ;;  %376 = vmatprep.mubr.msk.bf16.mxu0 %vm85_vm2, %v396_v3  ;;  %v402_v11 = vld [vmem:[%s528_s0 + $0x18] sm:$0xff]  }
   0x4   :  { %384 = vmatprep.mubr.msk.bf16.mxu1 %vm85_vm2, %v397_v5  ;;  %v403_v12 = vld [vmem:[%s528_s0 + $0x38] sm:$0xff]   ;;  %v315_v13 = vld [vmem:[%s529_s2] ss:$0 sm:$0xff] }
   0x5   :  { %374 = vmatprep.subr.bf16.mxu0 %v115_v6  ;;  %392 = vmatprep.subr.bf16.mxu1 %v115_v6 }
   0x6   :  { %375 = vmatpush3.bf16.msra.mxu0 %v115_v6  ;;  %393 = vmatpush3.bf16.msra.mxu1 %v115_v6 }
   0x9   :  { %377 = vmatmul.mubr.msk.bf16.vlgmr.msra.gmra.mrb[0].mxu0 %vm85_vm2, %v398_v7  ;;  %385 = vmatmul.mubr.msk.bf16.vlgmr.msra.gmra.mrb[0].mxu1 %vm85_vm2, %v399_v8 }
   0xa   :  { %380 = vmatprep.mubr.msk.bf16.mxu0 %vm85_vm2, %v400_v9  ;;  %388 = vmatprep.mubr.msk.bf16.mxu1 %vm85_vm2, %v401_v10 }
  0x11   :  { %381 = vmatmul.mubr.msk.bf16.gmra.mrb[4].mxu0 %vm85_vm2, %v402_v11  ;;  %389 = vmatmul.mubr.msk.bf16.gmra.mrb[4].mxu1 %vm85_vm2, %v403_v12 }
  0xdc   :  { %v378_v14 = vpop.f32.mrb[0].mxu0  ;;  %v386_v15 = vpop.f32.mrb[0].mxu1 }
  0xdd   :  { %v160_v16 = vadd.f32 %v378_v14, %v315_v13  ;;  %v192_v17 = vadd.f32 %v386_v15, %v315_v13  ;;  %v151_v18 = vpop.f32.mrb[1].mxu0  ;;  %v183_v19 = vpop.f32.mrb[1].mxu1 }
  0xde   :  { %v152_v20 = vadd.f32 %v315_v13, %v151_v18  ;;  %v184_v21 = vadd.f32 %v315_v13, %v183_v19  ;;  %v379_v22 = vpop.f32.mrb[2].mxu0  ;;  %v387_v23 = vpop.f32.mrb[2].mxu1 }
  0xdf   :  { %v216_v24 = vmax.f32 %v160_v16, 0.0  ;;  %v224_v25 = vmax.f32 %v192_v17, 0.0  ;;  %v163_v26 = vadd.f32 %v379_v22, %v315_v13  ;;  %v195_v27 = vadd.f32 %v387_v23, %v315_v13  ;;  %v154_v28 = vpop.f32.mrb[3].mxu0  ;;  %v186_v29 = vpop.f32.mrb[3].mxu1 }
  0xe0   :  { %v214_v30 = vmax.f32 %v152_v20, 0.0  ;;  %v222_v31 = vmax.f32 %v184_v21, 0.0  ;;  %v155_v32 = vadd.f32 %v315_v13, %v154_v28  ;;  %v187_v33 = vadd.f32 %v315_v13, %v186_v29 }
  0xe1   :  { %v351_v34 = vpack.c.bf16 %v216_v24, %v216_v24  ;;  %v359_v35 = vpack.c.bf16 %v224_v25, %v224_v25  ;;  %v217_v36 = vmax.f32 %v163_v26, 0.0  ;;  %v225_v37 = vmax.f32 %v195_v27, 0.0 }
  0xe2   :  { %v349_v38 = vpack.c.bf16 %v214_v30, %v214_v30  ;;  %v357_v39 = vpack.c.bf16 %v222_v31, %v222_v31  ;;  %v215_v40 = vmax.f32 %v155_v32, 0.0  ;;  %v223_v41 = vmax.f32 %v187_v33, 0.0 }
  0xe3   :  { %297 = vst.msk [vmem:[%s530_s3 + $0x8] sm:$0xf] %vm294_vm3, %v351_v34  ;;  %305 = vst.msk [vmem:[%s530_s3 + $0x28] sm:$0xf] %vm294_vm3, %v359_v35  ;;  %v352_v42 = vpack.c.bf16 %v217_v36, %v217_v36  ;;  %v360_v43 = vpack.c.bf16 %v225_v37, %v225_v37 }
  0xe4   :  { %295 = vst.msk [vmem:[%s530_s3] sm:$0xf] %vm294_vm3, %v349_v38  ;;  %303 = vst.msk [vmem:[%s530_s3 + $0x20] sm:$0xf] %vm294_vm3, %v357_v39  ;;  %v350_v44 = vpack.c.bf16 %v215_v40, %v215_v40  ;;  %v358_v45 = vpack.c.bf16 %v223_v41, %v223_v41  ;;  %v382_v46 = vpop.f32.mrb[4].mxu0  ;;  %v390_v47 = vpop.f32.mrb[4].mxu1 }
  0xe5   :  { %298 = vst.msk [vmem:[%s530_s3 + $0xc] sm:$0xf] %vm294_vm3, %v352_v42  ;;  %306 = vst.msk [vmem:[%s530_s3 + $0x2c] sm:$0xf] %vm294_vm3, %v360_v43  ;;  %v176_v48 = vadd.f32 %v382_v46, %v315_v13  ;;  %v208_v49 = vadd.f32 %v390_v47, %v315_v13  ;;  %v167_v50 = vpop.f32.mrb[5].mxu0  ;;  %v199_v51 = vpop.f32.mrb[5].mxu1 }
  0xe6   :  { %296 = vst.msk [vmem:[%s530_s3 + $0x4] sm:$0xf] %vm294_vm3, %v350_v44  ;;  %304 = vst.msk [vmem:[%s530_s3 + $0x24] sm:$0xf] %vm294_vm3, %v358_v45  ;;  %v168_v52 = vadd.f32 %v315_v13, %v167_v50  ;;  %v200_v53 = vadd.f32 %v315_v13, %v199_v51  ;;  %v383_v54 = vpop.f32.mrb[6].mxu0  ;;  %v391_v55 = vpop.f32.mrb[6].mxu1 }
  0xe7   :  { %v220_v56 = vmax.f32 %v176_v48, 0.0  ;;  %v228_v57 = vmax.f32 %v208_v49, 0.0  ;;  %v179_v58 = vadd.f32 %v383_v54, %v315_v13  ;;  %v211_v59 = vadd.f32 %v391_v55, %v315_v13  ;;  %v170_v60 = vpop.f32.mrb[7].mxu0  ;;  %v202_v61 = vpop.f32.mrb[7].mxu1 }
  0xe8   :  { %v218_v62 = vmax.f32 %v168_v52, 0.0  ;;  %v226_v63 = vmax.f32 %v200_v53, 0.0  ;;  %v171_v0 = vadd.f32 %v315_v13, %v170_v60  ;;  %v203_v1 = vadd.f32 %v315_v13, %v202_v61 }
  0xe9   :  { %v355_v2 = vpack.c.bf16 %v220_v56, %v220_v56  ;;  %v363_v3 = vpack.c.bf16 %v228_v57, %v228_v57  ;;  %v221_v4 = vmax.f32 %v179_v58, 0.0  ;;  %v229_v5 = vmax.f32 %v211_v59, 0.0 }
  0xea   :  { %v353_v6 = vpack.c.bf16 %v218_v62, %v218_v62  ;;  %v361_v7 = vpack.c.bf16 %v226_v63, %v226_v63  ;;  %v219_v8 = vmax.f32 %v171_v0, 0.0  ;;  %v227_v9 = vmax.f32 %v203_v1, 0.0 }
  0xeb   :  { %301 = vst.msk [vmem:[%s530_s3 + $0x18] sm:$0xf] %vm294_vm3, %v355_v2  ;;  %309 = vst.msk [vmem:[%s530_s3 + $0x38] sm:$0xf] %vm294_vm3, %v363_v3  ;;  %v356_v10 = vpack.c.bf16 %v221_v4, %v221_v4  ;;  %v364_v11 = vpack.c.bf16 %v229_v5, %v229_v5 }
  0xec   :  { %299 = vst.msk [vmem:[%s530_s3 + $0x10] sm:$0xf] %vm294_vm3, %v353_v6  ;;  %307 = vst.msk [vmem:[%s530_s3 + $0x30] sm:$0xf] %vm294_vm3, %v361_v7  ;;  %v354_v12 = vpack.c.bf16 %v219_v8, %v219_v8  ;;  %v362_v13 = vpack.c.bf16 %v227_v9, %v227_v9 }
  0xed   :  { %302 = vst.msk [vmem:[%s530_s3 + $0x1c] sm:$0xf] %vm294_vm3, %v356_v10  ;;  %310 = vst.msk [vmem:[%s530_s3 + $0x3c] sm:$0xf] %vm294_vm3, %v364_v11 }
  0xee   :  { %300 = vst.msk [vmem:[%s530_s3 + $0x14] sm:$0xf] %vm294_vm3, %v354_v12  ;;  %308 = vst.msk [vmem:[%s530_s3 + $0x34] sm:$0xf] %vm294_vm3, %v362_v13 }

// kernel: smscae_forward.7
= control target key start
LH: loop header
LB: loop body
LE: loop exit
PB: predicated region body
PF: predicated region fallthrough
CT: control target
= control target key end

     0   :  { %vm56_vm0 = vcmask 293888   ;;  %vm63_vm1 = vcmask 1041408   ;;  %vm136_vm2 = vcmask 60416   ;;  %s232_s1 = inlined_call_operand.vmem [shape: bf16[36,8], index: 1, kind: input, shape index: {}]   ;;  %s233_s0 = inlined_call_operand.vmem [shape: bf16[32,36], index: 0, kind: input, shape index: {}]   ;;  %s234_s2 = inlined_call_operand.vmem [shape: f32[1,8], index: 2, kind: input, shape index: {}]   ;;  %s235_s3 = inlined_call_operand.vmem [shape: bf16[32,8], index: 3, kind: output, shape index: {}]  }
   0x1   :  { %v177_v0 = vld [vmem:[%s232_s1] sm:$0xff]   ;;  %v178_v1 = vld [vmem:[%s232_s1 + $0x8] sm:$0xff]   ;;  %v179_v3 = vld [vmem:[%s232_s1 + $0x10] ss:$0 sps:$4 sm:$0x33]  }
   0x2   :  { %166 = vmatprep.subr.bf16.mxu0 %v177_v0  ;;  %v180_v2 = vld [vmem:[%s233_s0] sm:$0xff]   ;;  %v65_v4 = vsel %vm63_vm1, %v179_v3, 0  ;;  %v181_v5 = vld [vmem:[%s233_s0 + $0x8] sm:$0xff]  }
   0x3   :  { %167 = vmatpush3.bf16.msra.mxu0 %v177_v0  ;;  %172 = vmatprep.mubr.msk.bf16.mxu0 %vm56_vm0, %v180_v2  ;;  %v145_v6 = vld [vmem:[%s234_s2] ss:$0 sm:$0xff] }
   0x4   :  { %168 = vmatprep.subr.bf16.mxu0 %v178_v1 }
   0x7   :  { %169 = vmatpush3.bf16.msra.mxu0 %v178_v1 }
   0x8   :  { %176 = vmatprep.subr.msk.bf16.mxu0 %vm63_vm1, %v179_v3 }
   0xb   :  { %171 = vmatpush3.bf16.msra.mxu0 %v65_v4 }
   0xe   :  { %173 = vmatmul.mubr.msk.bf16.vlgmr.msra.gmra.mrb[0].mxu0 %vm56_vm0, %v181_v5 }
  0xe1   :  { %v174_v7 = vpop.f32.mrb[0].mxu0 }
  0xe2   :  { %v110_v8 = vadd.f32 %v174_v7, %v145_v6  ;;  %v101_v9 = vpop.f32.mrb[1].mxu0 }
  0xe3   :  { %v102_v10 = vadd.f32 %v145_v6, %v101_v9  ;;  %v175_v11 = vpop.f32.mrb[2].mxu0 }
  0xe4   :  { %v118_v12 = vmax.f32 %v110_v8, 0.0  ;;  %v113_v13 = vadd.f32 %v175_v11, %v145_v6  ;;  %v104_v14 = vpop.f32.mrb[3].mxu0 }
  0xe5   :  { %v116_v15 = vmax.f32 %v102_v10, 0.0  ;;  %v105_v16 = vadd.f32 %v145_v6, %v104_v14 }
  0xe6   :  { %v159_v17 = vpack.c.bf16 %v118_v12, %v118_v12  ;;  %v119_v18 = vmax.f32 %v113_v13, 0.0 }
  0xe7   :  { %v157_v19 = vpack.c.bf16 %v116_v15, %v116_v15  ;;  %v117_v20 = vmax.f32 %v105_v16, 0.0 }
  0xe8   :  { %139 = vst.msk [vmem:[%s235_s3 + $0x8] sm:$0xf] %vm136_vm2, %v159_v17  ;;  %v160_v21 = vpack.c.bf16 %v119_v18, %v119_v18 }
  0xe9   :  { %137 = vst.msk [vmem:[%s235_s3] sm:$0xf] %vm136_vm2, %v157_v19  ;;  %v158_v22 = vpack.c.bf16 %v117_v20, %v117_v20 }
  0xea   :  { %140 = vst.msk [vmem:[%s235_s3 + $0xc] sm:$0xf] %vm136_vm2, %v160_v21 }
  0xeb   :  { %138 = vst.msk [vmem:[%s235_s3 + $0x4] sm:$0xf] %vm136_vm2, %v158_v22 }

// kernel: smscae_forward.8
= control target key start
LH: loop header
LB: loop body
LE: loop exit
PB: predicated region body
PF: predicated region fallthrough
CT: control target
= control target key end

     0   :  { %v194_v0 = vmov 0.0   ;;  %vm195_vm0 = vmmov 0   ;;  %v196_v2 = vmov 0   ;;  %v130_v12 = vlaneseq  ;;  %s258_s1 = inlined_call_operand.vmem [shape: bf16[128,32], index: 1, kind: input, shape index: {}]   ;;  %s259_s3 = inlined_call_operand.vmem [shape: s32[8,1], index: 3, kind: input, shape index: {}]   ;;  %s260_s0 = inlined_call_operand.vmem [shape: bf16[8,128], index: 0, kind: input, shape index: {}]   ;;  %s261_s2 = inlined_call_operand.vmem [shape: f32[1,32], index: 2, kind: input, shape index: {}]   ;;  %s262_s4 = inlined_call_operand.vmem [shape: f32[8,32], index: 4, kind: output, shape index: {}]  }
   0x1   :  { %162 = vmatprep.subr.bf16.mxu0 %v194_v0  ;;  %v186_v1 = vld [vmem:[%s258_s1] sm:$0xff]   ;;  %178 = vmatprep.mubr.msk.bf16.mxu0 %vm195_vm0, %v194_v0  ;;  %v187_v3 = vld [vmem:[%s258_s1 + $0x8] sm:$0xff]   ;;  %v188_v4 = vld [vmem:[%s258_s1 + $0x10] sm:$0xff]   ;;  %vm138_vm2 = vcmask 261120  }
   0x2   :  { %185 = vset.pattern.permute.xlu0 %v196_v2  ;;  %163 = vmatpush3.bf16.msra.mxu0 %v186_v1  ;;  %v132_v5 = vld [vmem:[%s259_s3] sm:$0xff]  ;;  %v189_v6 = vld [vmem:[%s258_s1 + $0x18] sm:$0xff]   ;;  %v191_v8 = vld [vmem:[%s258_s1 + $0x28] sm:$0xff]   ;;  %v131_v13 = vand.u32 127, %v130_v12 }
   0x3   :  { %164 = vmatprep.subr.bf16.mxu0 %v194_v0  ;;  %134 = vperm.xlu0 %185, %v132_v5   ;;  %v190_v7 = vld [vmem:[%s258_s1 + $0x20] sm:$0xff]   ;;  %v192_v9 = vld [vmem:[%s258_s1 + $0x30] sm:$0xff]   ;;  %v193_v10 = vld [vmem:[%s258_s1 + $0x38] sm:$0xff]  }
   0x4   :  { %v18_v11 = vld [vmem:[%s260_s0] sm:$0xf] }
   0x5   :  { %v144_v15 = vld [vmem:[%s261_s2] ss:$0 sm:$0xff] }
   0x6   :  { %165 = vmatpush3.bf16.msra.mxu0 %v187_v3 }
   0x7   :  { %166 = vmatprep.subr.bf16.mxu0 %v194_v0 }
   0xa   :  { %167 = vmatpush3.bf16.msra.mxu0 %v188_v4 }
   0xb   :  { %168 = vmatprep.subr.bf16.mxu0 %v194_v0 }
   0xe   :  { %169 = vmatpush3.bf16.msra.mxu0 %v189_v6 }
   0xf   :  { %170 = vmatprep.subr.bf16.mxu0 %v194_v0 }
  0x12   :  { %171 = vmatpush3.bf16.msra.mxu0 %v190_v7 }
  0x13   :  { %172 = vmatprep.subr.bf16.mxu0 %v194_v0 }
  0x16   :  { %173 = vmatpush3.bf16.msra.mxu0 %v191_v8 }
  0x17   :  { %174 = vmatprep.subr.bf16.mxu0 %v194_v0 }
  0x1a   :  { %175 = vmatpush3.bf16.msra.mxu0 %v192_v9 }
  0x1b   :  { %176 = vmatprep.subr.bf16.mxu0 %v194_v0 }
  0x1e   :  { %177 = vmatpush3.bf16.msra.mxu0 %v193_v10 }
  0x21   :  { %179 = vmatmul.mubr.bf16.vlgmr.msra.gmra.mrb[0].mxu0 %v18_v11 }
  0x82   :  { %v135_v14 = vpop.permute.xlu0 %134 }
  0x83   :  { %vm136_vm1 = vcmp.lt.s32.totalorder %v131_v13, %v135_v14 }
  0xf4   :  { %v124_v16 = vpop.f32.mrb[0].mxu0 }
  0xf5   :  { %v125_v17 = vadd.f32 %v144_v15, %v124_v16  ;;  %v180_v18 = vpop.f32.mrb[1].mxu0 }
  0xf6   :  { %v127_v19 = vpop.f32.mrb[2].mxu0 }
  0xf7   :  { %v137_v20 = vsel %vm136_vm1, %v125_v17, 0.0  ;;  %v181_v21 = vpop.f32.mrb[3].mxu0 }
  0xf8   :  { %139 = vst.msk [vmem:[%s262_s4] sm:$0xff] %vm138_vm2, %v137_v20 }

// kernel: smscae_forward.9
= control target key start
LH: loop header
LB: loop body
LE: loop exit
PB: predicated region body
PF: predicated region fallthrough
CT: control target
= control target key end

     0   :  { %v109_v0 = vmov 0.0   ;;  %vm110_vm0 = vmmov 0   ;;  %vm39_vm1 = vcmask 261120   ;;  %s146_s1 = inlined_call_operand.vmem [shape: bf16[32,128], index: 1, kind: input, shape index: {}]   ;;  %s147_s0 = inlined_call_operand.vmem [shape: bf16[8,32], index: 0, kind: input, shape index: {}]   ;;  %s148_s2 = inlined_call_operand.vmem [shape: f32[1,128], index: 2, kind: input, shape index: {}]   ;;  %s149_s3 = inlined_call_operand.vmem [shape: bf16[8,128], index: 3, kind: output, shape index: {}]  }
   0x1   :  { %97 = vmatprep.subr.bf16.mxu0 %v109_v0  ;;  %v107_v1 = vld [vmem:[%s146_s1] sm:$0xff]   ;;  %101 = vmatprep.mubr.msk.bf16.mxu0 %vm110_vm0, %v109_v0  ;;  %v108_v2 = vld [vmem:[%s146_s1 + $0x8] sm:$0xff]  }
   0x2   :  { %98 = vmatpush3.bf16.msra.mxu0 %v107_v1  ;;  %v15_v3 = vld [vmem:[%s147_s0] sm:$0xf] }
   0x3   :  { %99 = vmatprep.subr.bf16.mxu0 %v109_v0  ;;  %v90_v4 = vld [vmem:[%s148_s2] ss:$0 sm:$0xff] }
   0x6   :  { %100 = vmatpush3.bf16.msra.mxu0 %v108_v2 }
   0x9   :  { %102 = vmatmul.mubr.msk.bf16.vlgmr.msra.gmra.mrb[0].mxu0 %vm39_vm1, %v15_v3 }
  0xdc   :  { %v77_v5 = vpop.f32.mrb[0].mxu0 }
  0xdd   :  { %v78_v6 = vadd.f32 %v90_v4, %v77_v5  ;;  %v103_v7 = vpop.f32.mrb[1].mxu0 }
  0xde   :  { %v80_v8 = vpop.f32.mrb[2].mxu0 }
  0xdf   :  { %v83_v9 = vmax.f32 %v78_v6, 0.0  ;;  %v104_v10 = vpop.f32.mrb[3].mxu0 }
  0xe1   :  { %v84_v11 = vpack.c.bf16 %v83_v9, %v83_v9 }
  0xe3   :  { %85 = vst [vmem:[%s149_s3] sm:$0xf] %v84_v11 }

// kernel: smscae_forward.10
= control target key start
LH: loop header
LB: loop body
LE: loop exit
PB: predicated region body
PF: predicated region fallthrough
CT: control target
= control target key end

     0   :  { %vm52_vm0 = vcmask 261120   ;;  %vm128_vm1 = vcmask 125952   ;;  %s215_s1 = inlined_call_operand.vmem [shape: bf16[32,16], index: 1, kind: input, shape index: {}]   ;;  %s216_s0 = inlined_call_operand.vmem [shape: bf16[32,32], index: 0, kind: input, shape index: {}]   ;;  %s217_s2 = inlined_call_operand.vmem [shape: f32[1,16], index: 2, kind: input, shape index: {}]   ;;  %s218_s3 = inlined_call_operand.vmem [shape: bf16[32,16], index: 3, kind: output, shape index: {}]  }
   0x1   :  { %v164_v0 = vld [vmem:[%s215_s1] sm:$0xff]   ;;  %v165_v1 = vld [vmem:[%s215_s1 + $0x8] sm:$0xff]  }
   0x2   :  { %156 = vmatprep.subr.bf16.mxu0 %v164_v0  ;;  %v166_v2 = vld [vmem:[%s216_s0] sm:$0xff]   ;;  %v167_v3 = vld [vmem:[%s216_s0 + $0x8] sm:$0xff]  }
   0x3   :  { %157 = vmatpush3.bf16.msra.mxu0 %v164_v0  ;;  %160 = vmatprep.mubr.msk.bf16.mxu0 %vm52_vm0, %v166_v2  ;;  %v137_v4 = vld [vmem:[%s217_s2] ss:$0 sm:$0xff] }
   0x4   :  { %158 = vmatprep.subr.bf16.mxu0 %v165_v1 }
   0x7   :  { %159 = vmatpush3.bf16.msra.mxu0 %v165_v1 }
   0xa   :  { %161 = vmatmul.mubr.msk.bf16.vlgmr.msra.gmra.mrb[0].mxu0 %vm52_vm0, %v167_v3 }
  0xdd   :  { %v162_v5 = vpop.f32.mrb[0].mxu0 }
  0xde   :  { %v102_v6 = vadd.f32 %v162_v5, %v137_v4  ;;  %v93_v7 = vpop.f32.mrb[1].mxu0 }
  0xdf   :  { %v94_v8 = vadd.f32 %v137_v4, %v93_v7  ;;  %v163_v9 = vpop.f32.mrb[2].mxu0 }
  0xe0   :  { %v110_v10 = vmax.f32 %v102_v6, 0.0  ;;  %v105_v11 = vadd.f32 %v163_v9, %v137_v4  ;;  %v96_v12 = vpop.f32.mrb[3].mxu0 }
  0xe1   :  { %v108_v13 = vmax.f32 %v94_v8, 0.0  ;;  %v97_v14 = vadd.f32 %v137_v4, %v96_v12 }
  0xe2   :  { %v150_v15 = vpack.c.bf16 %v110_v10, %v110_v10  ;;  %v111_v16 = vmax.f32 %v105_v11, 0.0 }
  0xe3   :  { %v148_v17 = vpack.c.bf16 %v108_v13, %v108_v13  ;;  %v109_v18 = vmax.f32 %v97_v14, 0.0 }
  0xe4   :  { %131 = vst.msk [vmem:[%s218_s3 + $0x8] sm:$0xf] %vm128_vm1, %v150_v15  ;;  %v151_v19 = vpack.c.bf16 %v111_v16, %v111_v16 }
  0xe5   :  { %129 = vst.msk [vmem:[%s218_s3] sm:$0xf] %vm128_vm1, %v148_v17  ;;  %v149_v20 = vpack.c.bf16 %v109_v18, %v109_v18 }
  0xe6   :  { %132 = vst.msk [vmem:[%s218_s3 + $0xc] sm:$0xf] %vm128_vm1, %v151_v19 }
  0xe7   :  { %130 = vst.msk [vmem:[%s218_s3 + $0x4] sm:$0xf] %vm128_vm1, %v149_v20 }

// kernel: smscae_forward.11
= control target key start
LH: loop header
LB: loop body
LE: loop exit
PB: predicated region body
PF: predicated region fallthrough
CT: control target
= control target key end

     0   :  { %vm86_vm0 = vcmask 130048   ;;  %vm304_vm1 = vcmask 31744   ;;  %s601_s1 = inlined_call_operand.vmem [shape: bf16[16,4], index: 1, kind: input, shape index: {}]   ;;  %s602_s0 = inlined_call_operand.vmem [shape: bf16[128,16], index: 0, kind: input, shape index: {}]   ;;  %s603_s2 = inlined_call_operand.vmem [shape: f32[1,4], index: 2, kind: input, shape index: {}]   ;;  %s604_s3 = inlined_call_operand.vmem [shape: f32[128,4], index: 3, kind: output, shape index: {}]  }
   0x1   :  { %v388_v0 = vld [vmem:[%s601_s1] sm:$0xff]   ;;  %v391_v3 = vld [vmem:[%s602_s0 + $0x8] sm:$0xff]   ;;  %v393_v5 = vld [vmem:[%s602_s0 + $0x10] sm:$0xff]  }
   0x2   :  { %v389_v1 = vld [vmem:[%s602_s0] sm:$0xff]   ;;  %368 = vmatprep.subr.bf16.mxu0 %v388_v0  ;;  %386 = vmatprep.subr.bf16.mxu1 %v388_v0  ;;  %v392_v4 = vld [vmem:[%s602_s0 + $0x28] sm:$0xff]   ;;  %v394_v6 = vld [vmem:[%s602_s0 + $0x30] sm:$0xff]  }
   0x3   :  { %v390_v2 = vld [vmem:[%s602_s0 + $0x20] sm:$0xff]   ;;  %369 = vmatpush3.bf16.msra.mxu0 %v388_v0  ;;  %387 = vmatpush3.bf16.msra.mxu1 %v388_v0  ;;  %v395_v7 = vld [vmem:[%s602_s0 + $0x18] sm:$0xff]  }
   0x4   :  { %370 = vmatprep.mubr.msk.bf16.mxu0 %vm86_vm0, %v389_v1  ;;  %378 = vmatprep.mubr.msk.bf16.mxu1 %vm86_vm0, %v390_v2  ;;  %v396_v8 = vld [vmem:[%s602_s0 + $0x38] sm:$0xff]   ;;  %v519_v9 = vld [vmem:[%s603_s2] ss:$0 sm:$0xff] }
   0x6   :  { %371 = vmatmul.mubr.msk.bf16.vlgmr.msra.gmra.mrb[0].mxu0 %vm86_vm0, %v391_v3  ;;  %379 = vmatmul.mubr.msk.bf16.vlgmr.msra.gmra.mrb[0].mxu1 %vm86_vm0, %v392_v4 }
   0x7   :  { %374 = vmatprep.mubr.msk.bf16.mxu0 %vm86_vm0, %v393_v5  ;;  %382 = vmatprep.mubr.msk.bf16.mxu1 %vm86_vm0, %v394_v6 }
   0xe   :  { %375 = vmatmul.mubr.msk.bf16.gmra.mrb[4].mxu0 %vm86_vm0, %v395_v7  ;;  %383 = vmatmul.mubr.msk.bf16.gmra.mrb[4].mxu1 %vm86_vm0, %v396_v8 }
  0xd9   :  { %v372_v10 = vpop.f32.mrb[0].mxu0  ;;  %v380_v11 = vpop.f32.mrb[0].mxu1 }
  0xda   :  { %v154_v12 = vadd.f32 %v372_v10, %v519_v9  ;;  %v186_v13 = vadd.f32 %v380_v11, %v519_v9  ;;  %v145_v14 = vpop.f32.mrb[1].mxu0  ;;  %v177_v15 = vpop.f32.mrb[1].mxu1 }
  0xdb   :  { %v146_v16 = vadd.f32 %v519_v9, %v145_v14  ;;  %v178_v17 = vadd.f32 %v519_v9, %v177_v15  ;;  %v373_v18 = vpop.f32.mrb[2].mxu0  ;;  %v381_v19 = vpop.f32.mrb[2].mxu1 }
  0xdc   :  { %v345_v20 = vmul.f32 -1.442695, %v154_v12  ;;  %v353_v21 = vmul.f32 -1.442695, %v186_v13  ;;  %v157_v22 = vadd.f32 %v373_v18, %v519_v9  ;;  %v189_v23 = vadd.f32 %v381_v19, %v519_v9  ;;  %v148_v24 = vpop.f32.mrb[3].mxu0  ;;  %v180_v25 = vpop.f32.mrb[3].mxu1 }
  0xdd   :  { %v343_v26 = vmul.f32 -1.442695, %v146_v16  ;;  %v351_v27 = vmul.f32 -1.442695, %v178_v17  ;;  %v149_v28 = vadd.f32 %v519_v9, %v148_v24  ;;  %v181_v29 = vadd.f32 %v519_v9, %v180_v25 }
  0xde   :  { %397 = vpow2.f32 %v345_v20  ;;  %v346_v30 = vmul.f32 -1.442695, %v157_v22  ;;  %v354_v31 = vmul.f32 -1.442695, %v189_v23 }
  0xdf   :  { %399 = vpow2.f32 %v353_v21  ;;  %v344_v32 = vmul.f32 -1.442695, %v149_v28  ;;  %v352_v33 = vmul.f32 -1.442695, %v181_v29 }
  0xe0   :  { %401 = vpow2.f32 %v343_v26 }
  0xe1   :  { %403 = vpow2.f32 %v351_v27  ;;  %v376_v34 = vpop.f32.mrb[4].mxu0  ;;  %v384_v35 = vpop.f32.mrb[4].mxu1 }
  0xe2   :  { %405 = vpow2.f32 %v346_v30  ;;  %v170_v36 = vadd.f32 %v376_v34, %v519_v9  ;;  %v202_v37 = vadd.f32 %v384_v35, %v519_v9  ;;  %v161_v38 = vpop.f32.mrb[5].mxu0  ;;  %v193_v39 = vpop.f32.mrb[5].mxu1 }
  0xe3   :  { %407 = vpow2.f32 %v354_v31  ;;  %v162_v40 = vadd.f32 %v519_v9, %v161_v38  ;;  %v194_v41 = vadd.f32 %v519_v9, %v193_v39  ;;  %v377_v42 = vpop.f32.mrb[6].mxu0  ;;  %v385_v43 = vpop.f32.mrb[6].mxu1 }
  0xe4   :  { %409 = vpow2.f32 %v344_v32  ;;  %v349_v44 = vmul.f32 -1.442695, %v170_v36  ;;  %v357_v45 = vmul.f32 -1.442695, %v202_v37  ;;  %v173_v46 = vadd.f32 %v377_v42, %v519_v9  ;;  %v164_v47 = vpop.f32.mrb[7].mxu0  ;;  %v196_v48 = vpop.f32.mrb[7].mxu1 }
  0xe5   :  { %411 = vpow2.f32 %v352_v33  ;;  %v347_v49 = vmul.f32 -1.442695, %v162_v40  ;;  %v355_v50 = vmul.f32 -1.442695, %v194_v41  ;;  %v205_v5 = vadd.f32 %v385_v43, %v519_v9 }
  0xe6   :  { %413 = vpow2.f32 %v349_v44  ;;  %v350_v51 = vmul.f32 -1.442695, %v173_v46  ;;  %v165_v8 = vadd.f32 %v519_v9, %v164_v47  ;;  %v197_v12 = vadd.f32 %v519_v9, %v196_v48 }
  0xe7   :  { %415 = vpow2.f32 %v357_v45  ;;  %v358_v17 = vmul.f32 -1.442695, %v205_v5 }
  0xe8   :  { %v398_v52 = vpop.eup %397  ;;  %417 = vpow2.f32 %v347_v49  ;;  %v348_v20 = vmul.f32 -1.442695, %v165_v8  ;;  %v356_v9 = vmul.f32 -1.442695, %v197_v12 }
  0xe9   :  { %v400_v53 = vpop.eup %399  ;;  %v258_v54 = vadd.f32 1.0, %v398_v52  ;;  %419 = vpow2.f32 %v355_v50 }
  0xea   :  { %v402_v55 = vpop.eup %401  ;;  %v266_v56 = vadd.f32 1.0, %v400_v53  ;;  %421 = vpow2.f32 %v350_v51 }
  0xeb   :  { %v404_v57 = vpop.eup %403  ;;  %423 = vrcp.f32 %v258_v54  ;;  %v256_v58 = vadd.f32 1.0, %v402_v55 }
  0xec   :  { %v406_v59 = vpop.eup %405  ;;  %425 = vrcp.f32 %v266_v56  ;;  %v264_v60 = vadd.f32 1.0, %v404_v57 }
  0xed   :  { %v408_v61 = vpop.eup %407  ;;  %427 = vrcp.f32 %v256_v58  ;;  %v259_v62 = vadd.f32 1.0, %v406_v59 }
  0xee   :  { %v410_v63 = vpop.eup %409  ;;  %429 = vrcp.f32 %v264_v60  ;;  %v267_v0 = vadd.f32 1.0, %v408_v61 }
  0xef   :  { %v412_v1 = vpop.eup %411  ;;  %431 = vrcp.f32 %v259_v62  ;;  %v257_v2 = vadd.f32 1.0, %v410_v63 }
  0xf0   :  { %v414_v3 = vpop.eup %413  ;;  %433 = vrcp.f32 %v267_v0  ;;  %v265_v4 = vadd.f32 1.0, %v412_v1 }
  0xf1   :  { %v416_v6 = vpop.eup %415  ;;  %435 = vrcp.f32 %v257_v2  ;;  %v262_v7 = vadd.f32 1.0, %v414_v3 }
  0xf2   :  { %v418_v10 = vpop.eup %417  ;;  %437 = vrcp.f32 %v265_v4  ;;  %v270_v11 = vadd.f32 1.0, %v416_v6 }
  0xf3   :  { %v420_v13 = vpop.eup %419  ;;  %439 = vrcp.f32 %v262_v7  ;;  %v260_v14 = vadd.f32 1.0, %v418_v10 }
  0xf4   :  { %v422_v15 = vpop.eup %421  ;;  %441 = vrcp.f32 %v270_v11  ;;  %v268_v16 = vadd.f32 1.0, %v420_v13 }
  0xf5   :  { %v424_v18 = vpop.eup %423  ;;  %443 = vrcp.f32 %v260_v14  ;;  %v263_v19 = vadd.f32 1.0, %v422_v15 }
  0xf6   :  { %v426_v21 = vpop.eup %425  ;;  %307 = vst.msk [vmem:[%s604_s3 + $0x10] sm:$0xff] %vm304_vm1, %v424_v18  ;;  %445 = vrcp.f32 %v268_v16 }
  0xf7   :  { %v428_v22 = vpop.eup %427  ;;  %315 = vst.msk [vmem:[%s604_s3 + $0x50] sm:$0xff] %vm304_vm1, %v426_v21  ;;  %447 = vrcp.f32 %v263_v19 }
  0xf8   :  { %v430_v23 = vpop.eup %429  ;;  %305 = vst.msk [vmem:[%s604_s3] sm:$0xff] %vm304_vm1, %v428_v22  ;;  %449 = vpow2.f32 %v358_v17 }
  0xf9   :  { %v432_v24 = vpop.eup %431  ;;  %313 = vst.msk [vmem:[%s604_s3 + $0x40] sm:$0xff] %vm304_vm1, %v430_v23  ;;  %451 = vpow2.f32 %v348_v20 }
  0xfa   :  { %v434_v25 = vpop.eup %433  ;;  %308 = vst.msk [vmem:[%s604_s3 + $0x18] sm:$0xff] %vm304_vm1, %v432_v24  ;;  %453 = vpow2.f32 %v356_v9 }
  0xfb   :  { %v436_v26 = vpop.eup %435  ;;  %316 = vst.msk [vmem:[%s604_s3 + $0x58] sm:$0xff] %vm304_vm1, %v434_v25 }
  0xfc   :  { %v438_v27 = vpop.eup %437  ;;  %306 = vst.msk [vmem:[%s604_s3 + $0x8] sm:$0xff] %vm304_vm1, %v436_v26 }
  0xfd   :  { %v440_v28 = vpop.eup %439  ;;  %314 = vst.msk [vmem:[%s604_s3 + $0x48] sm:$0xff] %vm304_vm1, %v438_v27 }
  0xfe   :  { %v442_v29 = vpop.eup %441  ;;  %311 = vst.msk [vmem:[%s604_s3 + $0x30] sm:$0xff] %vm304_vm1, %v440_v28 }
  0xff   :  { %v444_v30 = vpop.eup %443  ;;  %319 = vst.msk [vmem:[%s604_s3 + $0x70] sm:$0xff] %vm304_vm1, %v442_v29 }
 0x100   :  { %v446_v31 = vpop.eup %445  ;;  %309 = vst.msk [vmem:[%s604_s3 + $0x20] sm:$0xff] %vm304_vm1, %v444_v30 }
 0x101   :  { %v448_v32 = vpop.eup %447  ;;  %317 = vst.msk [vmem:[%s604_s3 + $0x60] sm:$0xff] %vm304_vm1, %v446_v31 }
 0x102   :  { %v450_v33 = vpop.eup %449  ;;  %312 = vst.msk [vmem:[%s604_s3 + $0x38] sm:$0xff] %vm304_vm1, %v448_v32 }
 0x103   :  { %v452_v34 = vpop.eup %451  ;;  %v271_v35 = vadd.f32 1.0, %v450_v33 }
 0x104   :  { %v454_v36 = vpop.eup %453  ;;  %v261_v37 = vadd.f32 1.0, %v452_v34 }
 0x105   :  { %455 = vrcp.f32 %v271_v35  ;;  %v269_v38 = vadd.f32 1.0, %v454_v36 }
 0x106   :  { %457 = vrcp.f32 %v261_v37 }
 0x107   :  { %459 = vrcp.f32 %v269_v38 }
 0x10f   :  { %v456_v39 = vpop.eup %455 }
 0x110   :  { %v458_v40 = vpop.eup %457  ;;  %320 = vst.msk [vmem:[%s604_s3 + $0x78] sm:$0xff] %vm304_vm1, %v456_v39 }
 0x111   :  { %v460_v41 = vpop.eup %459  ;;  %310 = vst.msk [vmem:[%s604_s3 + $0x28] sm:$0xff] %vm304_vm1, %v458_v40 }
 0x112   :  { %318 = vst.msk [vmem:[%s604_s3 + $0x68] sm:$0xff] %vm304_vm1, %v460_v41 }

</bundles_post_ra>
